<compile_context>
chip_gen: v7x
topology: tpu7x:2x2x1
jax: 0.10.0
libtpu: 0.0.40
codegen_flags: <defaults>
</compile_context>

<pallas_src>
import functools
import math

import jax
import jax.numpy as jnp
from jax.experimental import pallas as pl
from jax.experimental.pallas import tpu as pltpu


def _transformer_layer_kernel(x_ref, wqkv_ref, win_ref, bin_ref, wo_ref,
                              bo_ref, wfc_ref, o_ref, attn_ref, *,
                              num_heads: int):
    """One grid step = one batch element.

    x_ref   : (1, L, C)   input tokens for this batch element
    wqkv_ref: (3, C, C)   q/k/v projection weights (pre-transposed)
    win_ref : (3, C, C)   MHA in_proj weights, split per q/k/v (pre-transposed)
    bin_ref : (3, 1, C)   MHA in_proj biases
    wo_ref  : (C, C)      MHA out_proj weight (pre-transposed)
    bo_ref  : (1, C)      MHA out_proj bias
    wfc_ref : (2, C, C)   fc1 / fc2 weights (pre-transposed)
    o_ref   : (1, L, C)   output
    attn_ref: (L, C) f32  VMEM scratch holding the concatenated head outputs
    """
    x = x_ref[0].astype(jnp.float32)                        # (L, C)
    _, c = x.shape
    d = c // num_heads
    scale = 1.0 / math.sqrt(d)

    # q/k/v projections (bias-free) followed by the MHA in_proj (with bias).
    q = jnp.dot(x, wqkv_ref[0], preferred_element_type=jnp.float32)
    k = jnp.dot(x, wqkv_ref[1], preferred_element_type=jnp.float32)
    v = jnp.dot(x, wqkv_ref[2], preferred_element_type=jnp.float32)
    q = jnp.dot(q, win_ref[0], preferred_element_type=jnp.float32) + bin_ref[0]
    k = jnp.dot(k, win_ref[1], preferred_element_type=jnp.float32) + bin_ref[1]
    v = jnp.dot(v, win_ref[2], preferred_element_type=jnp.float32) + bin_ref[2]

    # Scaled dot-product attention, one head at a time (stable softmax).
    for h in range(num_heads):
        lo = h * d
        qh = q[:, lo:lo + d] * scale                        # (L, d)
        kh = k[:, lo:lo + d]                                # (L, d)
        vh = v[:, lo:lo + d]                                # (L, d)
        # scores = qh @ kh^T  (contract on the head dim, no explicit transpose)
        s = jax.lax.dot_general(qh, kh, (((1,), (1,)), ((), ())),
                                preferred_element_type=jnp.float32)  # (L, L)
        s = s - jnp.max(s, axis=-1, keepdims=True)
        p = jnp.exp(s)
        p = p / jnp.sum(p, axis=-1, keepdims=True)
        attn_ref[:, lo:lo + d] = jnp.dot(
            p, vh, preferred_element_type=jnp.float32)      # (L, d)

    # MHA out_proj + residual, then the two-layer MLP + residual.
    a = jnp.dot(attn_ref[...], wo_ref[...],
                preferred_element_type=jnp.float32) + bo_ref[...]
    x1 = a + x
    y = jnp.dot(jnp.dot(x1, wfc_ref[0], preferred_element_type=jnp.float32),
                wfc_ref[1], preferred_element_type=jnp.float32) + x1
    o_ref[0] = y.astype(o_ref.dtype)


def transformer_layer(x: jax.Array, params: dict, num_heads: int) -> jax.Array:
    """Pallas TPU equivalent of TransformerLayer.forward. x: (L, N, C)."""
    l, n, c = x.shape
    assert c % num_heads == 0, "embed dim must be divisible by num_heads"

    # Pre-transpose all weights so the kernel computes y = x @ W directly.
    w_qkv = jnp.stack([params["wq"].T, params["wk"].T, params["wv"].T])   # (3,C,C)
    wi = params["in_proj_weight"]                                          # (3C,C)
    w_in = jnp.stack([wi[0:c].T, wi[c:2 * c].T, wi[2 * c:3 * c].T])        # (3,C,C)
    bi = params["in_proj_bias"]                                            # (3C,)
    b_in = jnp.stack([bi[0:c], bi[c:2 * c], bi[2 * c:3 * c]])[:, None, :]  # (3,1,C)
    w_out = params["out_proj_weight"].T                                    # (C,C)
    b_out = params["out_proj_bias"][None, :]                               # (1,C)
    w_fc = jnp.stack([params["wfc1"].T, params["wfc2"].T])                 # (2,C,C)

    x_nlc = jnp.transpose(x, (1, 0, 2))                                    # (N,L,C)

    kernel = functools.partial(_transformer_layer_kernel, num_heads=num_heads)

    out_nlc = pl.pallas_call(
        kernel,
        out_shape=jax.ShapeDtypeStruct((n, l, c), x.dtype),
        grid_spec=pltpu.PrefetchScalarGridSpec(
            num_scalar_prefetch=0,
            grid=(n,),
            in_specs=[
                pl.BlockSpec((1, l, c), lambda b: (b, 0, 0)),   # x (per batch)
                pl.BlockSpec((3, c, c), lambda b: (0, 0, 0)),   # w_qkv
                pl.BlockSpec((3, c, c), lambda b: (0, 0, 0)),   # w_in
                pl.BlockSpec((3, 1, c), lambda b: (0, 0, 0)),   # b_in
                pl.BlockSpec((c, c), lambda b: (0, 0)),         # w_out
                pl.BlockSpec((1, c), lambda b: (0, 0)),         # b_out
                pl.BlockSpec((2, c, c), lambda b: (0, 0, 0)),   # w_fc
            ],
            out_specs=pl.BlockSpec((1, l, c), lambda b: (b, 0, 0)),
            scratch_shapes=[pltpu.VMEM((l, c), jnp.float32)],
        ),
        compiler_params=pltpu.CompilerParams(
            dimension_semantics=("parallel",),
        ),
    )(x_nlc, w_qkv, w_in, b_in, w_out, b_out, w_fc)

    return jnp.transpose(out_nlc, (1, 0, 2))


def _reference(x, params, num_heads):
    """Pure-JAX replica of the PyTorch forward (for correctness checking)."""
    l, n, c = x.shape
    d = c // num_heads
    q = x @ params["wq"].T
    k = x @ params["wk"].T
    v = x @ params["wv"].T
    wi, bi = params["in_proj_weight"], params["in_proj_bias"]
    q = q @ wi[0:c].T + bi[0:c]
    k = k @ wi[c:2 * c].T + bi[c:2 * c]
    v = v @ wi[2 * c:3 * c].T + bi[2 * c:3 * c]

    def heads(t):  # (L, N, C) -> (N, H, L, d)
        return jnp.transpose(t.reshape(l, n, num_heads, d), (1, 2, 0, 3))

    qh, kh, vh = heads(q), heads(k), heads(v)
    s = jnp.einsum("nhld,nhmd->nhlm", qh, kh) / math.sqrt(d)
    p = jax.nn.softmax(s, axis=-1)
    o = jnp.einsum("nhlm,nhmd->nhld", p, vh)
    o = jnp.transpose(o, (2, 0, 1, 3)).reshape(l, n, c)
    o = o @ params["out_proj_weight"].T + params["out_proj_bias"]
    x1 = o + x
    return (x1 @ params["wfc1"].T) @ params["wfc2"].T + x1


if __name__ == "__main__":
    key = jax.random.PRNGKey(0)
    L, N, C, H = 8, 2, 32, 4   # (seq, batch, embed, heads)

    ks = jax.random.split(key, 10)
    wscale = 1.0 / math.sqrt(C)
    params = {
        "wq": jax.random.normal(ks[0], (C, C), jnp.float32) * wscale,
        "wk": jax.random.normal(ks[1], (C, C), jnp.float32) * wscale,
        "wv": jax.random.normal(ks[2], (C, C), jnp.float32) * wscale,
        "in_proj_weight": jax.random.normal(ks[3], (3 * C, C), jnp.float32) * wscale,
        "in_proj_bias": jax.random.normal(ks[4], (3 * C,), jnp.float32) * 0.1,
        "out_proj_weight": jax.random.normal(ks[5], (C, C), jnp.float32) * wscale,
        "out_proj_bias": jax.random.normal(ks[6], (C,), jnp.float32) * 0.1,
        "wfc1": jax.random.normal(ks[7], (C, C), jnp.float32) * wscale,
        "wfc2": jax.random.normal(ks[8], (C, C), jnp.float32) * wscale,
    }
    x = jax.random.normal(ks[9], (L, N, C), jnp.float32)

    out = jax.block_until_ready(transformer_layer(x, params, num_heads=H))
    ref = _reference(x, params, num_heads=H)

    assert out.shape == ref.shape, (out.shape, ref.shape)
    assert out.dtype == ref.dtype, (out.dtype, ref.dtype)
    max_err = float(jnp.max(jnp.abs(out - ref)))
    assert jnp.allclose(out, ref, atol=1e-4, rtol=1e-4), max_err

    print("KERNEL_OK")
</pallas_src>

<mosaic_0001>
module attributes {stable_mosaic.version = 11 : i64} {
  func.func @_transformer_layer_kernel(%arg0: i32, %arg1: memref<1x8x32xf32, #tpu.memory_space<vmem>>, %arg2: memref<3x32x32xf32, #tpu.memory_space<vmem>>, %arg3: memref<3x32x32xf32, #tpu.memory_space<vmem>>, %arg4: memref<3x1x32xf32, #tpu.memory_space<vmem>>, %arg5: memref<32x32xf32, #tpu.memory_space<vmem>>, %arg6: memref<1x32xf32, #tpu.memory_space<vmem>>, %arg7: memref<2x32x32xf32, #tpu.memory_space<vmem>>, %arg8: memref<1x8x32xf32, #tpu.memory_space<vmem>>, %arg9: memref<8x32xf32, #tpu.memory_space<vmem>>) attributes {dimension_semantics = [#tpu.dimension_semantics<parallel>], iteration_bounds = array<i64: 2>, scalar_prefetch = 0 : i64, scratch_operands = 1 : i64, tpu.core_type = #tpu.core_type<tc>, window_params = [{transform_indices = @transform_0, window_bounds = array<i64: 1, 8, 32>}, {pipeline_mode = #tpu.pipeline_mode<synchronous>, transform_indices = @transform_1, window_bounds = array<i64: 3, 32, 32>}, {pipeline_mode = #tpu.pipeline_mode<synchronous>, transform_indices = @transform_2, window_bounds = array<i64: 3, 32, 32>}, {pipeline_mode = #tpu.pipeline_mode<synchronous>, transform_indices = @transform_3, window_bounds = array<i64: 3, 1, 32>}, {pipeline_mode = #tpu.pipeline_mode<synchronous>, transform_indices = @transform_4, window_bounds = array<i64: 32, 32>}, {pipeline_mode = #tpu.pipeline_mode<synchronous>, transform_indices = @transform_5, window_bounds = array<i64: 1, 32>}, {pipeline_mode = #tpu.pipeline_mode<synchronous>, transform_indices = @transform_6, window_bounds = array<i64: 2, 32, 32>}, {transform_indices = @transform_7, window_bounds = array<i64: 1, 8, 32>}]} {
    %c0 = arith.constant 0 : index
    %c0_0 = arith.constant 0 : index
    %c0_1 = arith.constant 0 : index
    %0 = vector.load %arg1[%c0, %c0_0, %c0_1] : memref<1x8x32xf32, #tpu.memory_space<vmem>>, vector<1x8x32xf32>
    %1 = vector.shape_cast %0 : vector<1x8x32xf32> to vector<8x32xf32>
    %c0_2 = arith.constant 0 : index
    %c0_3 = arith.constant 0 : index
    %c0_4 = arith.constant 0 : index
    %2 = vector.load %arg2[%c0_2, %c0_3, %c0_4] : memref<3x32x32xf32, #tpu.memory_space<vmem>>, vector<1x32x32xf32>
    %3 = vector.shape_cast %2 : vector<1x32x32xf32> to vector<32x32xf32>
    %cst = arith.constant dense<0.000000e+00> : vector<8x32xf32>
    %4 = tpu.matmul %1, %3, %cst {dimension_numbers = #tpu.dot_dimension_numbers<[1], [0], [0], [1], [0, 0, 1, 1], [], []>} : vector<8x32xf32>, vector<32x32xf32>, vector<8x32xf32> -> vector<8x32xf32>
    %c1 = arith.constant 1 : index
    %c0_5 = arith.constant 0 : index
    %c0_6 = arith.constant 0 : index
    %5 = vector.load %arg2[%c1, %c0_5, %c0_6] : memref<3x32x32xf32, #tpu.memory_space<vmem>>, vector<1x32x32xf32>
    %6 = vector.shape_cast %5 : vector<1x32x32xf32> to vector<32x32xf32>
    %cst_7 = arith.constant dense<0.000000e+00> : vector<8x32xf32>
    %7 = tpu.matmul %1, %6, %cst_7 {dimension_numbers = #tpu.dot_dimension_numbers<[1], [0], [0], [1], [0, 0, 1, 1], [], []>} : vector<8x32xf32>, vector<32x32xf32>, vector<8x32xf32> -> vector<8x32xf32>
    %c2 = arith.constant 2 : index
    %c0_8 = arith.constant 0 : index
    %c0_9 = arith.constant 0 : index
    %8 = vector.load %arg2[%c2, %c0_8, %c0_9] : memref<3x32x32xf32, #tpu.memory_space<vmem>>, vector<1x32x32xf32>
    %9 = vector.shape_cast %8 : vector<1x32x32xf32> to vector<32x32xf32>
    %cst_10 = arith.constant dense<0.000000e+00> : vector<8x32xf32>
    %10 = tpu.matmul %1, %9, %cst_10 {dimension_numbers = #tpu.dot_dimension_numbers<[1], [0], [0], [1], [0, 0, 1, 1], [], []>} : vector<8x32xf32>, vector<32x32xf32>, vector<8x32xf32> -> vector<8x32xf32>
    %c0_11 = arith.constant 0 : index
    %c0_12 = arith.constant 0 : index
    %c0_13 = arith.constant 0 : index
    %11 = vector.load %arg3[%c0_11, %c0_12, %c0_13] : memref<3x32x32xf32, #tpu.memory_space<vmem>>, vector<1x32x32xf32>
    %12 = vector.shape_cast %11 : vector<1x32x32xf32> to vector<32x32xf32>
    %cst_14 = arith.constant dense<0.000000e+00> : vector<8x32xf32>
    %13 = tpu.matmul %4, %12, %cst_14 {dimension_numbers = #tpu.dot_dimension_numbers<[1], [0], [0], [1], [0, 0, 1, 1], [], []>} : vector<8x32xf32>, vector<32x32xf32>, vector<8x32xf32> -> vector<8x32xf32>
    %c0_15 = arith.constant 0 : index
    %c0_16 = arith.constant 0 : index
    %c0_17 = arith.constant 0 : index
    %14 = vector.load %arg4[%c0_15, %c0_16, %c0_17] : memref<3x1x32xf32, #tpu.memory_space<vmem>>, vector<1x1x32xf32>
    %15 = vector.shape_cast %14 : vector<1x1x32xf32> to vector<1x32xf32>
    %16 = vector.broadcast %15 : vector<1x32xf32> to vector<8x32xf32>
    %17 = arith.addf %13, %16 : vector<8x32xf32>
    %c1_18 = arith.constant 1 : index
    %c0_19 = arith.constant 0 : index
    %c0_20 = arith.constant 0 : index
    %18 = vector.load %arg3[%c1_18, %c0_19, %c0_20] : memref<3x32x32xf32, #tpu.memory_space<vmem>>, vector<1x32x32xf32>
    %19 = vector.shape_cast %18 : vector<1x32x32xf32> to vector<32x32xf32>
    %cst_21 = arith.constant dense<0.000000e+00> : vector<8x32xf32>
    %20 = tpu.matmul %7, %19, %cst_21 {dimension_numbers = #tpu.dot_dimension_numbers<[1], [0], [0], [1], [0, 0, 1, 1], [], []>} : vector<8x32xf32>, vector<32x32xf32>, vector<8x32xf32> -> vector<8x32xf32>
    %c1_22 = arith.constant 1 : index
    %c0_23 = arith.constant 0 : index
    %c0_24 = arith.constant 0 : index
    %21 = vector.load %arg4[%c1_22, %c0_23, %c0_24] : memref<3x1x32xf32, #tpu.memory_space<vmem>>, vector<1x1x32xf32>
    %22 = vector.shape_cast %21 : vector<1x1x32xf32> to vector<1x32xf32>
    %23 = vector.broadcast %22 : vector<1x32xf32> to vector<8x32xf32>
    %24 = arith.addf %20, %23 : vector<8x32xf32>
    %c2_25 = arith.constant 2 : index
    %c0_26 = arith.constant 0 : index
    %c0_27 = arith.constant 0 : index
    %25 = vector.load %arg3[%c2_25, %c0_26, %c0_27] : memref<3x32x32xf32, #tpu.memory_space<vmem>>, vector<1x32x32xf32>
    %26 = vector.shape_cast %25 : vector<1x32x32xf32> to vector<32x32xf32>
    %cst_28 = arith.constant dense<0.000000e+00> : vector<8x32xf32>
    %27 = tpu.matmul %10, %26, %cst_28 {dimension_numbers = #tpu.dot_dimension_numbers<[1], [0], [0], [1], [0, 0, 1, 1], [], []>} : vector<8x32xf32>, vector<32x32xf32>, vector<8x32xf32> -> vector<8x32xf32>
    %c2_29 = arith.constant 2 : index
    %c0_30 = arith.constant 0 : index
    %c0_31 = arith.constant 0 : index
    %28 = vector.load %arg4[%c2_29, %c0_30, %c0_31] : memref<3x1x32xf32, #tpu.memory_space<vmem>>, vector<1x1x32xf32>
    %29 = vector.shape_cast %28 : vector<1x1x32xf32> to vector<1x32xf32>
    %30 = vector.broadcast %29 : vector<1x32xf32> to vector<8x32xf32>
    %31 = arith.addf %27, %30 : vector<8x32xf32>
    %32 = vector.extract_strided_slice %17 {offsets = [0, 0], sizes = [8, 8], strides = [1, 1]} : vector<8x32xf32> to vector<8x8xf32>
    %cst_32 = arith.constant 0.353553385 : f32
    %33 = vector.broadcast %cst_32 : f32 to vector<8x8xf32>
    %34 = arith.mulf %32, %33 : vector<8x8xf32>
    %35 = vector.extract_strided_slice %24 {offsets = [0, 0], sizes = [8, 8], strides = [1, 1]} : vector<8x32xf32> to vector<8x8xf32>
    %36 = vector.extract_strided_slice %31 {offsets = [0, 0], sizes = [8, 8], strides = [1, 1]} : vector<8x32xf32> to vector<8x8xf32>
    %cst_33 = arith.constant dense<0.000000e+00> : vector<8x8xf32>
    %37 = tpu.matmul %34, %35, %cst_33 {dimension_numbers = #tpu.dot_dimension_numbers<[1], [1], [0], [0], [0, 0, 1, 0], [], []>} : vector<8x8xf32>, vector<8x8xf32>, vector<8x8xf32> -> vector<8x8xf32>
    %cst_34 = arith.constant dense<0xFF800000> : vector<8xf32>
    %38 = vector.multi_reduction <maximumf>, %37, %cst_34 [1] : vector<8x8xf32> to vector<8xf32>
    %39 = vector.shape_cast %38 : vector<8xf32> to vector<8x1xf32>
    %40 = vector.broadcast %39 : vector<8x1xf32> to vector<8x8xf32>
    %41 = arith.subf %37, %40 : vector<8x8xf32>
    %42 = math.exp %41 : vector<8x8xf32>
    %cst_35 = arith.constant dense<0.000000e+00> : vector<8xf32>
    %43 = vector.multi_reduction <add>, %42, %cst_35 [1] : vector<8x8xf32> to vector<8xf32>
    %44 = vector.shape_cast %43 : vector<8xf32> to vector<8x1xf32>
    %45 = vector.broadcast %44 : vector<8x1xf32> to vector<8x8xf32>
    %46 = arith.divf %42, %45 : vector<8x8xf32>
    %cst_36 = arith.constant dense<0.000000e+00> : vector<8x8xf32>
    %47 = tpu.matmul %46, %36, %cst_36 {dimension_numbers = #tpu.dot_dimension_numbers<[1], [0], [0], [1], [0, 0, 1, 1], [], []>} : vector<8x8xf32>, vector<8x8xf32>, vector<8x8xf32> -> vector<8x8xf32>
    %c0_37 = arith.constant 0 : index
    %c0_38 = arith.constant 0 : index
    %48 = vector.load %arg9[%c0_37, %c0_38] : memref<8x32xf32, #tpu.memory_space<vmem>>, vector<8x8xf32>
    tpu.vector_store %arg9[%c0_37, %c0_38], %47 {strides = array<i32>} : memref<8x32xf32, #tpu.memory_space<vmem>>, vector<8x8xf32>,
    %49 = vector.extract_strided_slice %17 {offsets = [0, 8], sizes = [8, 8], strides = [1, 1]} : vector<8x32xf32> to vector<8x8xf32>
    %cst_39 = arith.constant 0.353553385 : f32
    %50 = vector.broadcast %cst_39 : f32 to vector<8x8xf32>
    %51 = arith.mulf %49, %50 : vector<8x8xf32>
    %52 = vector.extract_strided_slice %24 {offsets = [0, 8], sizes = [8, 8], strides = [1, 1]} : vector<8x32xf32> to vector<8x8xf32>
    %53 = vector.extract_strided_slice %31 {offsets = [0, 8], sizes = [8, 8], strides = [1, 1]} : vector<8x32xf32> to vector<8x8xf32>
    %cst_40 = arith.constant dense<0.000000e+00> : vector<8x8xf32>
    %54 = tpu.matmul %51, %52, %cst_40 {dimension_numbers = #tpu.dot_dimension_numbers<[1], [1], [0], [0], [0, 0, 1, 0], [], []>} : vector<8x8xf32>, vector<8x8xf32>, vector<8x8xf32> -> vector<8x8xf32>
    %cst_41 = arith.constant dense<0xFF800000> : vector<8xf32>
    %55 = vector.multi_reduction <maximumf>, %54, %cst_41 [1] : vector<8x8xf32> to vector<8xf32>
    %56 = vector.shape_cast %55 : vector<8xf32> to vector<8x1xf32>
    %57 = vector.broadcast %56 : vector<8x1xf32> to vector<8x8xf32>
    %58 = arith.subf %54, %57 : vector<8x8xf32>
    %59 = math.exp %58 : vector<8x8xf32>
    %cst_42 = arith.constant dense<0.000000e+00> : vector<8xf32>
    %60 = vector.multi_reduction <add>, %59, %cst_42 [1] : vector<8x8xf32> to vector<8xf32>
    %61 = vector.shape_cast %60 : vector<8xf32> to vector<8x1xf32>
    %62 = vector.broadcast %61 : vector<8x1xf32> to vector<8x8xf32>
    %63 = arith.divf %59, %62 : vector<8x8xf32>
    %cst_43 = arith.constant dense<0.000000e+00> : vector<8x8xf32>
    %64 = tpu.matmul %63, %53, %cst_43 {dimension_numbers = #tpu.dot_dimension_numbers<[1], [0], [0], [1], [0, 0, 1, 1], [], []>} : vector<8x8xf32>, vector<8x8xf32>, vector<8x8xf32> -> vector<8x8xf32>
    %c0_44 = arith.constant 0 : index
    %c8 = arith.constant 8 : index
    %65 = vector.load %arg9[%c0_44, %c8] : memref<8x32xf32, #tpu.memory_space<vmem>>, vector<8x8xf32>
    tpu.vector_store %arg9[%c0_44, %c8], %64 {strides = array<i32>} : memref<8x32xf32, #tpu.memory_space<vmem>>, vector<8x8xf32>,
    %66 = vector.extract_strided_slice %17 {offsets = [0, 16], sizes = [8, 8], strides = [1, 1]} : vector<8x32xf32> to vector<8x8xf32>
    %cst_45 = arith.constant 0.353553385 : f32
    %67 = vector.broadcast %cst_45 : f32 to vector<8x8xf32>
    %68 = arith.mulf %66, %67 : vector<8x8xf32>
    %69 = vector.extract_strided_slice %24 {offsets = [0, 16], sizes = [8, 8], strides = [1, 1]} : vector<8x32xf32> to vector<8x8xf32>
    %70 = vector.extract_strided_slice %31 {offsets = [0, 16], sizes = [8, 8], strides = [1, 1]} : vector<8x32xf32> to vector<8x8xf32>
    %cst_46 = arith.constant dense<0.000000e+00> : vector<8x8xf32>
    %71 = tpu.matmul %68, %69, %cst_46 {dimension_numbers = #tpu.dot_dimension_numbers<[1], [1], [0], [0], [0, 0, 1, 0], [], []>} : vector<8x8xf32>, vector<8x8xf32>, vector<8x8xf32> -> vector<8x8xf32>
    %cst_47 = arith.constant dense<0xFF800000> : vector<8xf32>
    %72 = vector.multi_reduction <maximumf>, %71, %cst_47 [1] : vector<8x8xf32> to vector<8xf32>
    %73 = vector.shape_cast %72 : vector<8xf32> to vector<8x1xf32>
    %74 = vector.broadcast %73 : vector<8x1xf32> to vector<8x8xf32>
    %75 = arith.subf %71, %74 : vector<8x8xf32>
    %76 = math.exp %75 : vector<8x8xf32>
    %cst_48 = arith.constant dense<0.000000e+00> : vector<8xf32>
    %77 = vector.multi_reduction <add>, %76, %cst_48 [1] : vector<8x8xf32> to vector<8xf32>
    %78 = vector.shape_cast %77 : vector<8xf32> to vector<8x1xf32>
    %79 = vector.broadcast %78 : vector<8x1xf32> to vector<8x8xf32>
    %80 = arith.divf %76, %79 : vector<8x8xf32>
    %cst_49 = arith.constant dense<0.000000e+00> : vector<8x8xf32>
    %81 = tpu.matmul %80, %70, %cst_49 {dimension_numbers = #tpu.dot_dimension_numbers<[1], [0], [0], [1], [0, 0, 1, 1], [], []>} : vector<8x8xf32>, vector<8x8xf32>, vector<8x8xf32> -> vector<8x8xf32>
    %c0_50 = arith.constant 0 : index
    %c16 = arith.constant 16 : index
    %82 = vector.load %arg9[%c0_50, %c16] : memref<8x32xf32, #tpu.memory_space<vmem>>, vector<8x8xf32>
    tpu.vector_store %arg9[%c0_50, %c16], %81 {strides = array<i32>} : memref<8x32xf32, #tpu.memory_space<vmem>>, vector<8x8xf32>,
    %83 = vector.extract_strided_slice %17 {offsets = [0, 24], sizes = [8, 8], strides = [1, 1]} : vector<8x32xf32> to vector<8x8xf32>
    %cst_51 = arith.constant 0.353553385 : f32
    %84 = vector.broadcast %cst_51 : f32 to vector<8x8xf32>
    %85 = arith.mulf %83, %84 : vector<8x8xf32>
    %86 = vector.extract_strided_slice %24 {offsets = [0, 24], sizes = [8, 8], strides = [1, 1]} : vector<8x32xf32> to vector<8x8xf32>
    %87 = vector.extract_strided_slice %31 {offsets = [0, 24], sizes = [8, 8], strides = [1, 1]} : vector<8x32xf32> to vector<8x8xf32>
    %cst_52 = arith.constant dense<0.000000e+00> : vector<8x8xf32>
    %88 = tpu.matmul %85, %86, %cst_52 {dimension_numbers = #tpu.dot_dimension_numbers<[1], [1], [0], [0], [0, 0, 1, 0], [], []>} : vector<8x8xf32>, vector<8x8xf32>, vector<8x8xf32> -> vector<8x8xf32>
    %cst_53 = arith.constant dense<0xFF800000> : vector<8xf32>
    %89 = vector.multi_reduction <maximumf>, %88, %cst_53 [1] : vector<8x8xf32> to vector<8xf32>
    %90 = vector.shape_cast %89 : vector<8xf32> to vector<8x1xf32>
    %91 = vector.broadcast %90 : vector<8x1xf32> to vector<8x8xf32>
    %92 = arith.subf %88, %91 : vector<8x8xf32>
    %93 = math.exp %92 : vector<8x8xf32>
    %cst_54 = arith.constant dense<0.000000e+00> : vector<8xf32>
    %94 = vector.multi_reduction <add>, %93, %cst_54 [1] : vector<8x8xf32> to vector<8xf32>
    %95 = vector.shape_cast %94 : vector<8xf32> to vector<8x1xf32>
    %96 = vector.broadcast %95 : vector<8x1xf32> to vector<8x8xf32>
    %97 = arith.divf %93, %96 : vector<8x8xf32>
    %cst_55 = arith.constant dense<0.000000e+00> : vector<8x8xf32>
    %98 = tpu.matmul %97, %87, %cst_55 {dimension_numbers = #tpu.dot_dimension_numbers<[1], [0], [0], [1], [0, 0, 1, 1], [], []>} : vector<8x8xf32>, vector<8x8xf32>, vector<8x8xf32> -> vector<8x8xf32>
    %c0_56 = arith.constant 0 : index
    %c24 = arith.constant 24 : index
    %99 = vector.load %arg9[%c0_56, %c24] : memref<8x32xf32, #tpu.memory_space<vmem>>, vector<8x8xf32>
    tpu.vector_store %arg9[%c0_56, %c24], %98 {strides = array<i32>} : memref<8x32xf32, #tpu.memory_space<vmem>>, vector<8x8xf32>,
    %c0_57 = arith.constant 0 : index
    %c0_58 = arith.constant 0 : index
    %100 = vector.load %arg9[%c0_57, %c0_58] : memref<8x32xf32, #tpu.memory_space<vmem>>, vector<8x32xf32>
    %c0_59 = arith.constant 0 : index
    %c0_60 = arith.constant 0 : index
    %101 = vector.load %arg5[%c0_59, %c0_60] : memref<32x32xf32, #tpu.memory_space<vmem>>, vector<32x32xf32>
    %cst_61 = arith.constant dense<0.000000e+00> : vector<8x32xf32>
    %102 = tpu.matmul %100, %101, %cst_61 {dimension_numbers = #tpu.dot_dimension_numbers<[1], [0], [0], [1], [0, 0, 1, 1], [], []>} : vector<8x32xf32>, vector<32x32xf32>, vector<8x32xf32> -> vector<8x32xf32>
    %c0_62 = arith.constant 0 : index
    %c0_63 = arith.constant 0 : index
    %103 = vector.load %arg6[%c0_62, %c0_63] : memref<1x32xf32, #tpu.memory_space<vmem>>, vector<1x32xf32>
    %104 = vector.broadcast %103 : vector<1x32xf32> to vector<8x32xf32>
    %105 = arith.addf %102, %104 : vector<8x32xf32>
    %106 = arith.addf %105, %1 : vector<8x32xf32>
    %c0_64 = arith.constant 0 : index
    %c0_65 = arith.constant 0 : index
    %c0_66 = arith.constant 0 : index
    %107 = vector.load %arg7[%c0_64, %c0_65, %c0_66] : memref<2x32x32xf32, #tpu.memory_space<vmem>>, vector<1x32x32xf32>
    %108 = vector.shape_cast %107 : vector<1x32x32xf32> to vector<32x32xf32>
    %cst_67 = arith.constant dense<0.000000e+00> : vector<8x32xf32>
    %109 = tpu.matmul %106, %108, %cst_67 {dimension_numbers = #tpu.dot_dimension_numbers<[1], [0], [0], [1], [0, 0, 1, 1], [], []>} : vector<8x32xf32>, vector<32x32xf32>, vector<8x32xf32> -> vector<8x32xf32>
    %c1_68 = arith.constant 1 : index
    %c0_69 = arith.constant 0 : index
    %c0_70 = arith.constant 0 : index
    %110 = vector.load %arg7[%c1_68, %c0_69, %c0_70] : memref<2x32x32xf32, #tpu.memory_space<vmem>>, vector<1x32x32xf32>
    %111 = vector.shape_cast %110 : vector<1x32x32xf32> to vector<32x32xf32>
    %cst_71 = arith.constant dense<0.000000e+00> : vector<8x32xf32>
    %112 = tpu.matmul %109, %111, %cst_71 {dimension_numbers = #tpu.dot_dimension_numbers<[1], [0], [0], [1], [0, 0, 1, 1], [], []>} : vector<8x32xf32>, vector<32x32xf32>, vector<8x32xf32> -> vector<8x32xf32>
    %113 = arith.addf %112, %106 : vector<8x32xf32>
    %c0_72 = arith.constant 0 : index
    %c0_73 = arith.constant 0 : index
    %c0_74 = arith.constant 0 : index
    %114 = vector.load %arg8[%c0_72, %c0_73, %c0_74] : memref<1x8x32xf32, #tpu.memory_space<vmem>>, vector<1x8x32xf32>
    %115 = vector.shape_cast %114 : vector<1x8x32xf32> to vector<8x32xf32>
    %116 = vector.shape_cast %113 : vector<8x32xf32> to vector<1x8x32xf32>
    tpu.vector_store %arg8[%c0_72, %c0_73, %c0_74], %116 {strides = array<i32>} : memref<1x8x32xf32, #tpu.memory_space<vmem>>, vector<1x8x32xf32>,
    return
  }
  func.func @transform_0(%arg0: i32) -> (i32, i32, i32) {
    %c0_i32 = arith.constant 0 : i32
    %c0_i32_0 = arith.constant 0 : i32
    %c0_i32_1 = arith.constant 0 : i32
    return %arg0, %c0_i32, %c0_i32_0 : i32, i32, i32
  }
  func.func @transform_1(%arg0: i32) -> (i32, i32, i32) {
    %c0_i32 = arith.constant 0 : i32
    %c0_i32_0 = arith.constant 0 : i32
    %c0_i32_1 = arith.constant 0 : i32
    %c0_i32_2 = arith.constant 0 : i32
    return %c0_i32, %c0_i32_0, %c0_i32_1 : i32, i32, i32
  }
  func.func @transform_2(%arg0: i32) -> (i32, i32, i32) {
    %c0_i32 = arith.constant 0 : i32
    %c0_i32_0 = arith.constant 0 : i32
    %c0_i32_1 = arith.constant 0 : i32
    %c0_i32_2 = arith.constant 0 : i32
    return %c0_i32, %c0_i32_0, %c0_i32_1 : i32, i32, i32
  }
  func.func @transform_3(%arg0: i32) -> (i32, i32, i32) {
    %c0_i32 = arith.constant 0 : i32
    %c0_i32_0 = arith.constant 0 : i32
    %c0_i32_1 = arith.constant 0 : i32
    %c0_i32_2 = arith.constant 0 : i32
    return %c0_i32, %c0_i32_0, %c0_i32_1 : i32, i32, i32
  }
  func.func @transform_4(%arg0: i32) -> (i32, i32) {
    %c0_i32 = arith.constant 0 : i32
    %c0_i32_0 = arith.constant 0 : i32
    %c0_i32_1 = arith.constant 0 : i32
    return %c0_i32, %c0_i32_0 : i32, i32
  }
  func.func @transform_5(%arg0: i32) -> (i32, i32) {
    %c0_i32 = arith.constant 0 : i32
    %c0_i32_0 = arith.constant 0 : i32
    %c0_i32_1 = arith.constant 0 : i32
    return %c0_i32, %c0_i32_0 : i32, i32
  }
  func.func @transform_6(%arg0: i32) -> (i32, i32, i32) {
    %c0_i32 = arith.constant 0 : i32
    %c0_i32_0 = arith.constant 0 : i32
    %c0_i32_1 = arith.constant 0 : i32
    %c0_i32_2 = arith.constant 0 : i32
    return %c0_i32, %c0_i32_0, %c0_i32_1 : i32, i32, i32
  }
  func.func @transform_7(%arg0: i32) -> (i32, i32, i32) {
    %c0_i32 = arith.constant 0 : i32
    %c0_i32_0 = arith.constant 0 : i32
    %c0_i32_1 = arith.constant 0 : i32
    return %arg0, %c0_i32, %c0_i32_0 : i32, i32, i32
  }
}

</mosaic_0001>

<bundles_post_ra>
// kernel: tpu_custom_call.1
= control target key start
LH: loop header
LB: loop body
LE: loop exit
PB: predicated region body
PF: predicated region fallthrough
CT: control target
= control target key end

     0   :  { %12 = vsyncpa [#allocation4], 0  ;;  %s2991_s0 = inlined_call_operand.hbm [shape: f32[2,8,32], index: 0, kind: input, shape index: {}]   ;;  %s2992_s1 = inlined_call_operand.hbm [shape: f32[3,32,32], index: 1, kind: input, shape index: {}]   ;;  %s2993_s2 = inlined_call_operand.hbm [shape: f32[3,32,32], index: 2, kind: input, shape index: {}]   ;;  %s2994_s3 = inlined_call_operand.vmem [shape: f32[3,1,32], index: 3, kind: input, shape index: {}]   ;;  %s2995_s4 = inlined_call_operand.hbm [shape: f32[32,32], index: 4, kind: input, shape index: {}]   ;;  %s2996_s5 = inlined_call_operand.vmem [shape: f32[1,32], index: 5, kind: input, shape index: {}]   ;;  %s2997_s6 = inlined_call_operand.hbm [shape: f32[2,32,32], index: 6, kind: input, shape index: {}]   ;;  %s2998_s7 = inlined_call_operand.hbm [shape: f32[2,8,32], index: 7, kind: output, shape index: {}]  }
   0x1   :  { %14 = vsyncpa [#allocation4 + $0x1], 0 }
   0x2   :  { %15 = vsyncpa [#allocation7], 0 }
   0x3   :  { %16 = vsyncpa [#allocation10], 0 }
   0x4   :  { %17 = vsyncpa [#allocation5], 0 }
   0x5   :  { %19 = vsyncpa [#allocation5 + $0x1], 0  ;;  %s2568_s24 = smov 0   ;;  %s2570_s25 = smov 0  }
   0x6   :  { %s2572_s26 = smov 0   ;;  %s2574_s27 = smov 0  }
   0x7 LB: > { %s2511_s28 = smov [#allocation6]   ;;  %s2589_s30 = sadd.s32 4294967295, %s2509_s27   ;;  %s2509_s27 = sphi %s2574_s27, %s3022_s27   ;;  %s2505_s26 = sphi %s2572_s26, %s3021_s26   ;;  %s2501_s25 = sphi %s2570_s25, %s3020_s25   ;;  %s2497_s24 = sphi %s2568_s24, %s3019_s24  }
   0x8   : > { %s220_s29 = sshll.u32 %s2511_s28, 4  ;;  %p1879_p0 = scmp.ge.s32.totalorder %s2509_s27, 1  ;;  %s2594_s29 = int_to_ptr.vmem [resolvable:$true] %s220_s29 }
   0x9   : > { %p2999_p1 = scmp.eq.s32.totalorder %s2589_s30, 0  ;;  %p208_p2 = scmp.lt.s32.totalorder %s2509_s27, 3 }
   0xa   : > { %s2512_s9 = smov [#allocation9]   ;;  %s2513_s12 = smov [#allocation8]  }
   0xb   : > { %p2596_p3 = pnand %p1879_p0, %p208_p2  ;;  %s249_s10 = sshll.u32 %s2512_s9, 4  ;;  %s2609_s10 = int_to_ptr.vmem [resolvable:$true] %s249_s10 }
   0xc   : > { %s233_s13 = sshll.u32 %s2513_s12, 4  ;;  %s2293_s16 = scalar_lea.hbm %s2992_s1, 1536  ;;  %s2611_s13 = int_to_ptr.vmem [resolvable:$true] %s233_s13 }
   0xd   : > { %s3002_s8 = scalar_select %p2596_p3, 1, 0 }
   0xe   : > { %p2199_p5 = pneg %p2596_p3  ;;  %p2294_p7 = scmp.ne.s32.totalorder %s2992_s1, %s2293_s16 }
   0xf   : > { %p2300_p11 = scmp.lt.u32.totalorder %s2293_s16, %s2992_s1 }
  0x10   : > { %p2605_p6 = pnand %p2199_p5, %p2999_p1 }
  0x12   : > { %p2621_p8 = pneg %p2605_p6 }
  0x14   : > { %p2296_p9 = pnand %p2621_p8, %p2294_p7 }
  0x16   : > { %p2297_p10 = pneg %p2296_p9 }
  0x18   : > { %p2302_p12 = pnand %p2300_p11, %p2297_p10 }
  0x1a   : > { %2305 = shalt.err (!%p2302_p12)
}
  0x1b   : > { %s2306_s22 = scalar_lea.vmem %s2594_s29, 1536  ;;  %p2314_p5 = scmp.lt.s32.totalorder %s2594_s29, %s2594_s29 }
  0x1c   : > { %p2307_p13 = scmp.ne.s32.totalorder %s2594_s29, %s2306_s22  ;;  %p2315_p4 = scmp.lt.s32.totalorder %s2306_s22, %s2306_s22 }
  0x1e   : > { %p2309_p0 = pnand %p2307_p13, %p2621_p8  ;;  %p2316_p7 = por %p2315_p4, %p2314_p5 }
  0x20   : > { %p2310_p2 = pneg %p2309_p0 }
  0x22   : > { %p2317_p9 = pnand %p2316_p7, %p2310_p2 }
  0x24   : > { %2320 = shalt.err (!%p2317_p9)
}
  0x25   : > { %s2514_s23 = smov 128   ;;  %s2515_s28 = smov 8  }
  0x26   : > { %2202 = dma.hbm_to_vmem [thread:$0]  (!%p2605_p6), %s2992_s1, 1536, %s2594_s29, [#allocation7], %s2514_s23, %s2514_s23, %s2515_s28  }
  0x27   : > { %s2321_s16 = scalar_lea.hbm %s2995_s4, 512 }
  0x28   : > { %p2322_p4 = scmp.ne.s32.totalorder %s2995_s4, %s2321_s16  ;;  %p2328_p12 = scmp.lt.u32.totalorder %s2321_s16, %s2995_s4 }
  0x2a   : > { %p2324_p10 = pnand %p2322_p4, %p2621_p8 }
  0x2c   : > { %p2325_p11 = pneg %p2324_p10 }
  0x2e   : > { %p2330_p13 = pnand %p2328_p12, %p2325_p11 }
  0x30   : > { %2333 = shalt.err (!%p2330_p13)
}
  0x31   : > { %s2334_s29 = scalar_lea.vmem %s2609_s10, 512  ;;  %p2342_p7 = scmp.lt.s32.totalorder %s2609_s10, %s2609_s10 }
  0x32   : > { %p2335_p0 = scmp.ne.s32.totalorder %s2609_s10, %s2334_s29  ;;  %p2343_p9 = scmp.lt.s32.totalorder %s2334_s29, %s2334_s29 }
  0x34   : > { %p2337_p2 = pnand %p2335_p0, %p2621_p8  ;;  %p2344_p4 = por %p2343_p9, %p2342_p7 }
  0x36   : > { %p2338_p5 = pneg %p2337_p2 }
  0x38   : > { %p2345_p10 = pnand %p2344_p4, %p2338_p5 }
  0x3a   : > { %2348 = shalt.err (!%p2345_p10)
}
  0x3b   : > { %2208 = dma.hbm_to_vmem [thread:$0]  (!%p2605_p6), %s2995_s4, 512, %s2609_s10, [#allocation10], %s2514_s23, %s2514_s23, %s2515_s28  }
  0x3c   : > { %s2349_s15 = scalar_lea.hbm %s2993_s2, 1536 }
  0x3d   : > { %p2350_p11 = scmp.ne.s32.totalorder %s2993_s2, %s2349_s15  ;;  %p2356_p0 = scmp.lt.u32.totalorder %s2349_s15, %s2993_s2 }
  0x3f   : > { %p2352_p12 = pnand %p2350_p11, %p2621_p8 }
  0x41   : > { %p2353_p13 = pneg %p2352_p12 }
  0x43   : > { %p2358_p2 = pnand %p2356_p0, %p2353_p13 }
  0x45   : > { %2361 = shalt.err (!%p2358_p2)
}
  0x46   : > { %s2362_s10 = scalar_lea.vmem %s2611_s13, 1536  ;;  %p2370_p4 = scmp.lt.s32.totalorder %s2611_s13, %s2611_s13 }
  0x47   : > { %p2363_p5 = scmp.ne.s32.totalorder %s2611_s13, %s2362_s10  ;;  %p2371_p10 = scmp.lt.s32.totalorder %s2362_s10, %s2362_s10 }
  0x49   : > { %p2365_p7 = pnand %p2363_p5, %p2621_p8  ;;  %p2372_p11 = por %p2371_p10, %p2370_p4 }
  0x4b   : > { %p2366_p9 = pneg %p2365_p7 }
  0x4d   : > { %p2373_p12 = pnand %p2372_p11, %p2366_p9 }
  0x4f   : > { %2376 = shalt.err (!%p2373_p12)
}
  0x50   : > { %2205 = dma.hbm_to_vmem [thread:$0]  (!%p2605_p6), %s2993_s2, 1536, %s2611_s13, [#allocation7], %s2514_s23, %s2514_s23, %s2515_s28  }
  0x51   : > { %s2516_s22 = smov [#allocation11]   ;;  %s2377_s15 = scalar_lea.hbm %s2997_s6, 1024 }
  0x52   : > { %s265_s9 = sshll.u32 %s2516_s22, 4  ;;  %p2378_p13 = scmp.ne.s32.totalorder %s2997_s6, %s2377_s15  ;;  %s266_s9 = int_to_ptr.vmem [resolvable:$true] %s265_s9 }
  0x53   : > { %p2384_p5 = scmp.lt.u32.totalorder %s2377_s15, %s2997_s6 }
  0x54   : > { %p2380_p0 = pnand %p2378_p13, %p2621_p8 }
  0x56   : > { %p2381_p2 = pneg %p2380_p0 }
  0x58   : > { %p2386_p7 = pnand %p2384_p5, %p2381_p2 }
  0x5a   : > { %2389 = shalt.err (!%p2386_p7)
}
  0x5b   : > { %s2390_s13 = scalar_lea.vmem %s266_s9, 1024  ;;  %p2398_p11 = scmp.lt.s32.totalorder %s266_s9, %s266_s9 }
  0x5c   : > { %p2391_p9 = scmp.ne.s32.totalorder %s266_s9, %s2390_s13  ;;  %p2399_p12 = scmp.lt.s32.totalorder %s2390_s13, %s2390_s13 }
  0x5e   : > { %p2393_p4 = pnand %p2391_p9, %p2621_p8  ;;  %p2400_p1 = por %p2399_p12, %p2398_p11 }
  0x60   : > { %p2394_p10 = pneg %p2393_p4 }
  0x62   : > { %p2401_p3 = pnand %p2400_p1, %p2394_p10 }
  0x64   : > { %2404 = shalt.err (!%p2401_p3)
}
  0x65   : > { %2211 = dma.hbm_to_vmem [thread:$0]  (!%p2605_p6), %s2997_s6, 1024, %s266_s9, [#allocation10], %s2514_s23, %s2514_s23, %s2515_s28  }
  0x66   : > { %s1878_s11 = sadd.s32 4294967294, %s2509_s27   ;;  %s2720_s19 = sadd.s32 1, %s2509_s27  }
  0x67   : > { %s29_s29 = ssub.s32 %s2509_s27, %s2720_s19  ;;  %s32_s22 = sadd.s32 1, %s2505_s26 }
  0x68   : > { %p30_p1 = scmp.eq.s32.totalorder %s29_s29, 0  ;;  %p39_p3 = scmp.ne.s32.totalorder %s2505_s26, %s2501_s25 }
  0x69   : > { %p40_p8 = scmp.eq.s32.totalorder %s2509_s27, 0  ;;  %p45_p13 = scmp.ne.s32.totalorder %s2501_s25, %s2497_s24 }
  0x6a   : > { %s2731_s12 = scalar_select %p30_p1, %s2505_s26, %s32_s22  }
  0x6b   : > { %p2733_p0 = por %p40_p8, %p39_p3  ;;  %p3006_p2 = scmp.eq.s32.totalorder %s2589_s30, 0 }
  0x6c   : > { %p195_p5 = scmp.eq.s32.totalorder %s2589_s30, 1  ;;  %p201_p7 = scmp.eq.s32.totalorder %s1878_s11, 1 }
  0x6d   : > { %p2739_p6 = por %p3006_p2, %p45_p13  ;;  %p2224_p9 = scmp.lt.s32.totalorder %s2509_s27, 2 }
  0x6e   : > { %s279_s28 = sand.u32 1, %s2505_s26   ;;  %p2746_p4 = por %p195_p5, %p39_p3 }
  0x6f   : > { %p2750_p10 = por %p201_p7, %p45_p13  ;;  %s1885_s16 = sshll.u32 %s279_s28, 3 }
  0x70   : > { %s3008_s9 = scalar_select %p2746_p4, 1, 0 }
  0x71   : > { %s3009_s15 = scalar_select %p2750_p10, 1, 0 }
  0x72   : > { %s1886_s17 = sshll.u32 %s2509_s27, 7  ;;  %s283_s10 = scalar_lea.vmem [#allocation3], %s1885_s16 }
  0x73   : > { %s2758_s13 = scalar_lea.hbm %s2991_s0, %s1886_s17  ;;  %s290_s21 = sshll.u32 %s283_s10, 4  ;;  %s2760_s21 = int_to_ptr.vmem [resolvable:$true] %s290_s21 }
  0x74   : > { %p2764_p11 = pnand %p2224_p9, %p2733_p0  ;;  %s280_s29 = scalar_lea.sflag [#allocation4], %s279_s28 }
  0x75   : > { %s2405_s22 = scalar_lea.hbm %s2758_s13, 128  ;;  %s2410_s18 = scalar_lea.hbm %s2991_s0, 256 }
  0x76   : > { %p2406_p12 = scmp.ne.s32.totalorder %s2758_s13, %s2405_s22  ;;  %p2407_p1 = pneg %p2764_p11 }
  0x77   : > { %p2411_p13 = scmp.lt.u32.totalorder %s2758_s13, %s2991_s0  ;;  %p2412_p0 = scmp.lt.u32.totalorder %s2410_s18, %s2405_s22 }
  0x78   : > { %p2408_p3 = pnand %p2407_p1, %p2406_p12  ;;  %p2414_p5 = scmp.lt.u32.totalorder %s2405_s22, %s2758_s13 }
  0x79   : > { %p2413_p2 = por %p2412_p0, %p2411_p13 }
  0x7a   : > { %p2409_p8 = pneg %p2408_p3 }
  0x7b   : > { %p2415_p7 = por %p2414_p5, %p2413_p2 }
  0x7d   : > { %p2416_p9 = pnand %p2415_p7, %p2409_p8 }
  0x7f   : > { %2419 = shalt.err (!%p2416_p9)
}
  0x80   : > { %s2420_s28 = scalar_lea.vmem %s2760_s21, 128  ;;  %s2517_s10 = smov [#allocation3]  }
  0x81   : > { %p2421_p12 = scmp.ne.s32.totalorder %s2760_s21, %s2420_s28  ;;  %s2425_s16 = sshll.u32 %s2517_s10, 4  ;;  %s2426_s16 = int_to_ptr.vmem [resolvable:$false] %s2425_s16 }
  0x82   : > { %s2427_s17 = scalar_lea.vmem %s2426_s16, 256  ;;  %p2428_p4 = scmp.lt.s32.totalorder %s2760_s21, %s2426_s16 }
  0x83   : > { %p2423_p3 = pnand %p2421_p12, %p2407_p1  ;;  %p2429_p13 = scmp.lt.s32.totalorder %s2427_s17, %s2420_s28 }
  0x85   : > { %p2424_p10 = pneg %p2423_p3  ;;  %p2430_p0 = por %p2429_p13, %p2428_p4 }
  0x87   : > { %p2431_p2 = pnand %p2430_p0, %p2424_p10 }
  0x89   : > { %2434 = shalt.err (!%p2431_p2)
}
  0x8a   : > { %2215 = dma.hbm_to_vmem [thread:$0]  (!%p2764_p11), %s2758_s13, 128, %s2760_s21, %s280_s29  }
  0x8b   : > { %p3011_p8 = scmp.ne.s32.totalorder %s3002_s8, 0 }
  0x8c   : > { %s2796_s22 = sand.u32 (!%p3011_p8), 1, %s2501_s25  }
  0x8d   : > { %299 = sbr.rel (%p3011_p8) target bundleno = 2236 (0x8bc), region = 48  ;;  %s1888_s18 = sshll.u32 (!%p3011_p8), %s2796_s22, 3 }
  0x8e   : > { %s302_s14 = scalar_lea.sflag (!%p3011_p8), [#allocation4], %s2796_s22  ;;  %s2802_s20 = scalar_lea.vmem (!%p3011_p8), [#allocation3], %s1888_s18 }
  0x94   : > { %2480 = dma.done.wait (%p2739_p6), %s302_s14, 128  }
  0x95   : > { %2482 = vsyncadd (%p2739_p6), %s302_s14, 4294967168  ;;  %p3012_p4 = scmp.eq.s32.totalorder %s2589_s30, 0 }
  0x97   : > { %2484 = dma.done.wait (%p3012_p4), [#allocation7], 3072   ;;  %p3013_p10 = pmov %p3012_p4 }
  0x98   : > { %p3014_p11 = pmov %p3012_p4 }
  0x99   : > { %2486 = vsyncadd (%p3013_p10), [#allocation7], 4294964224 }
  0x9a   : > { %2488 = dma.done.wait (%p3014_p11), [#allocation10], 1536   ;;  %p3015_p1 = pmov %p3012_p4 }
  0x9b   : > { %v2518_v0 = vmov 0.0|0.0   ;;  %vm2519_vm0 = vmmov 0   ;;  %v2520_v1 = vmov 0.0   ;;  %v432_v2 = vld [vmem:[#allocation6 + $0x20] sm:$0xff]  ;;  %v433_v3 = vld [vmem:[#allocation6 + $0x28] sm:$0xff]  ;;  %v434_v7 = vld [vmem:[#allocation6 + $0x30] sm:$0xff] }
  0x9c   : > { %2490 = vsyncadd (%p3015_p1), [#allocation10], 4294965760  ;;  %2131 = vmatprep.subr.bf16.mxu1 %v2518_v0  ;;  %2125 = vmatprep.subr.bf16.mxu0 %v2518_v0  ;;  %v353_v4 = vld [vmem:[#allocation6] sm:$0xff]  ;;  %v2132_v5 = vpack.c.bf16 %v433_v3, %v432_v2  ;;  %v354_v6 = vld [vmem:[#allocation6 + $0x8] sm:$0xff]  ;;  %vm357_vm1 = vcmask 261120   ;;  %vm838_vm2 = vcmask 64512  }
  0x9d   : > { %2005 = vmatprep.mubr.msk.f32.mxu1 %vm2519_vm0, %v2520_v1  ;;  %1994 = vmatprep.mubr.msk.f32.mxu0 %vm2519_vm0, %v2520_v1  ;;  %v435_v8 = vld [vmem:[#allocation6 + $0x38] sm:$0xff]  ;;  %v2126_v9 = vpack.c.bf16 %v354_v6, %v353_v4  ;;  %v355_v10 = vld [vmem:[#allocation6 + $0x10] sm:$0xff]  ;;  %v507_v14 = vld [vmem:[#allocation6 + $0x40] sm:$0xff]  ;;  %s2521_s11 = smov 112   ;;  %s2522_s29 = smov 120   ;;  %vm1170_vm3 = vcmask 130112  }
  0x9e   : > { %v356_v11 = vld [vmem:[#allocation6 + $0x18] sm:$0xff]  ;;  %2133 = vmatpush3.bf16.msra.mxu1 %v2132_v5  ;;  %v2135_v12 = vpack.c.bf16 %v435_v8, %v434_v7  ;;  %v508_v15 = vld [vmem:[#allocation6 + $0x48] sm:$0xff]  ;;  %v581_v16 = vld [vmem:[#allocation8] sm:$0xff]  ;;  %s2523_s16 = smov 104   ;;  %s2524_s17 = smov 8   ;;  %vm1341_vm4 = vcmask 195712  }
  0x9f   : > { %2127 = vmatpush3.bf16.msra.mxu0 %v2126_v9  ;;  %2134 = vmatprep.subr.bf16.mxu1 %v2518_v0  ;;  %v2129_v13 = vpack.c.bf16 %v356_v11, %v355_v10  ;;  %v582_v17 = vld [vmem:[#allocation8 + $0x8] sm:$0xff]  ;;  %v2825_v18 = vld [vmem:[%s2802_s20] sm:$0xff]  ;;  %v2138_v20 = vpack.c.bf16 %v508_v15, %v507_v14  ;;  %v666_v27 = vld [vmem:[#allocation8 + $0x20] sm:$0xff]  ;;  %s2525_s14 = smov 16   ;;  %s2526_s20 = smov 24   ;;  %vm1512_vm5 = vcmask 261312  }
  0xa0   : > { %2128 = vmatprep.subr.bf16.mxu0 %v2518_v0  ;;  %v2144_v19 = vpack.c.bf16 %v582_v17, %v581_v16  ;;  %v583_v21 = vld [vmem:[#allocation8 + $0x10] sm:$0xff]  ;;  %v584_v22 = vld [vmem:[#allocation8 + $0x18] sm:$0xff]  ;;  %v667_v28 = vld [vmem:[#allocation8 + $0x28] sm:$0xff]  ;;  %s1922_s13 = sshll.u32 %s2589_s30, 7  ;;  %s351_s21 = scalar_lea.vmem [#allocation12], %s1888_s18 }
  0xa1   : > { %v509_v23 = vld [vmem:[#allocation6 + $0x50] sm:$0xff]  ;;  %v510_v24 = vld [vmem:[#allocation6 + $0x58] sm:$0xff]  ;;  %v2147_v25 = vpack.c.bf16 %v584_v22, %v583_v21  ;;  %v2150_v29 = vpack.c.bf16 %v667_v28, %v666_v27  ;;  %v752_v33 = vld [vmem:[#allocation8 + $0x40] sm:$0xff]  ;;  %s2946_s10 = scalar_lea.hbm %s2998_s7, %s1922_s13  ;;  %p3016_p5 = scmp.ne.s32.totalorder %s3008_s9, 0 }
  0xa2   : > { %2136 = vmatpush3.bf16.msra.mxu1 %v2135_v12  ;;  %v2141_v26 = vpack.c.bf16 %v510_v24, %v509_v23  ;;  %v668_v30 = vld [vmem:[#allocation8 + $0x30] sm:$0xff]  ;;  %v669_v31 = vld [vmem:[#allocation8 + $0x38] sm:$0xff]  ;;  %v753_v34 = vld [vmem:[#allocation8 + $0x48] sm:$0xff]  ;;  %s2527_s18 = smov [#allocation12]  }
  0xa3   : > { %2130 = vmatpush3.bf16.msra.mxu0 %v2129_v13  ;;  %2143 = vmatprep.subr.bf16.mxu1 %v2518_v0  ;;  %v2153_v32 = vpack.c.bf16 %v669_v31, %v668_v30  ;;  %v2156_v35 = vpack.c.bf16 %v753_v34, %v752_v33  ;;  %v754_v37 = vld [vmem:[#allocation8 + $0x50] sm:$0xff]  ;;  %v755_v38 = vld [vmem:[#allocation8 + $0x58] sm:$0xff]  ;;  %v1900_v45 = vld [vmem:[%s2994_s3 + $0x1] ss:$0 sm:$0xff] }
  0xa4   : > { %2137 = vmatprep.subr.bf16.mxu0 %v2518_v0  ;;  %v2159_v42 = vpack.c.bf16 %v755_v38, %v754_v37  ;;  %v1897_v46 = vld [vmem:[%s2994_s3] ss:$0 sm:$0xff]  ;;  %v1903_v54 = vld [vmem:[%s2994_s3 + $0x2] ss:$0 sm:$0xff] }
  0xa5   : > { %2006 = vmatmul.mubr.msk.f32.vlgmr.msra.gmra.mrb[0].mxu1 %vm357_vm1, %v2825_v18 }
  0xa6   : > { %1995 = vmatmul.mubr.msk.f32.vlgmr.msra.gmra.mrb[0].mxu0 %vm357_vm1, %v2825_v18  ;;  %2145 = vmatpush3.bf16.msra.mxu1 %v2144_v19 }
  0xa7   : > { %2139 = vmatpush3.bf16.msra.mxu0 %v2138_v20  ;;  %2016 = vmatprep.mubr.msk.f32.mxu0 %vm2519_vm0, %v2520_v1 }
  0xa8   : > { %2140 = vmatprep.subr.bf16.mxu0 %v2518_v0  ;;  %2146 = vmatprep.subr.bf16.mxu1 %v2518_v0 }
  0xa9   : > { %2027 = vmatprep.mubr.msk.f32.mxu1 %vm2519_vm0, %v2520_v1 }
  0xaa   : > { %2148 = vmatpush3.bf16.msra.mxu1 %v2147_v25 }
  0xab   : > { %2142 = vmatpush3.bf16.msra.mxu0 %v2141_v26  ;;  %2155 = vmatprep.subr.bf16.mxu1 %v2518_v0 }
  0xac   : > { %2149 = vmatprep.subr.bf16.mxu0 %v2518_v0 }
  0xae   : > { %2017 = vmatmul.mubr.msk.f32.vlgmr.msra.gmra.mrb[2].mxu0 %vm357_vm1, %v2825_v18 }
  0xaf   : > { %2151 = vmatpush3.bf16.msra.mxu0 %v2150_v29  ;;  %2038 = vmatprep.mubr.msk.f32.mxu0 %vm2519_vm0, %v2520_v1 }
  0xb0   : > { %2152 = vmatprep.subr.bf16.mxu0 %v2518_v0 }
  0xb3   : > { %2154 = vmatpush3.bf16.msra.mxu0 %v2153_v32 }
  0xb4   : > { %2062 = vmatprep.subr.mxu0 %v2520_v1 }
 0x178   : > { %v502_v36 = vpop.f32.mrb[0].mxu1 }
 0x179   : > { %v427_v39 = vpop.f32.mrb[0].mxu0  ;;  %v2007_v40 = vpop.f32.mrb[1].mxu1  ;;  %2039 = vmatmul.mubr.msk.f32.vlgmr.msra.gmra.mrb[4].mxu0 %vm357_vm1, %v502_v36 }
 0x17a   : > { %v1996_v41 = vpop.f32.mrb[1].mxu0  ;;  %2028 = vmatmul.mubr.msk.f32.vlgmr.msra.gmra.mrb[2].mxu1 %vm357_vm1, %v427_v39  ;;  %2064 = vmatprep.mubr.msk.f32.mxu0 %vm2519_vm0, %v2520_v1 }
 0x17b   : > { %2157 = vmatpush3.bf16.msra.mxu1 %v2156_v35  ;;  %2049 = vmatprep.mubr.msk.f32.mxu1 %vm2519_vm0, %v2520_v1 }
 0x17c   : > { %2158 = vmatprep.subr.bf16.mxu1 %v2518_v0 }
 0x17f   : > { %2160 = vmatpush3.bf16.msra.mxu1 %v2159_v42 }
 0x180   : > { %2052 = vmatprep.subr.mxu1 %v2520_v1 }
 0x181   : > { %v577_v43 = vpop.f32.mrb[2].mxu0 }
 0x182   : > { %v2018_v44 = vpop.f32.mrb[3].mxu0  ;;  %2050 = vmatmul.mubr.msk.f32.vlgmr.msra.gmra.mrb[4].mxu1 %vm357_vm1, %v577_v43 }
 0x183   : > { %2054 = vmatprep.mubr.msk.f32.mxu1 %vm2519_vm0, %v2520_v1 }
 0x24c   : > { %v747_v47 = vpop.f32.mrb[4].mxu0 }
 0x24d   : > { %v748_v48 = vadd.f32 %v1900_v45, %v747_v47  ;;  %v661_v49 = vpop.f32.mrb[2].mxu1  ;;  %v2040_v50 = vpop.f32.mrb[5].mxu0 }
 0x24e   : > { %v662_v51 = vadd.f32 %v1897_v46, %v661_v49  ;;  %v2029_v52 = vpop.f32.mrb[3].mxu1 }
 0x24f   : > { %1174 = vrot.lane.b32.xlu1 %v748_v48, %s2521_s11  ;;  %1002 = vrot.lane.b32.xlu0 %v748_v48, %s2522_s29  ;;  %v1515_v52 = vld [vmem:[#allocation9] sm:$0xff] }
 0x250   : > { %v837_v53 = vmul.f32 0.35355338, %v662_v51  ;;  %2053 = vmatpush3.xpose.msk.msra.mxu1 %vm838_vm2, %v748_v48 }
 0x251   : > { %2057 = vmatprep.subr.mxu1 %v2520_v1 }
 0x253   : > { %2055 = vmatmul.mubr.msk.f32.vlgmr.msra.gmra.mrb[6].mxu1 %vm838_vm2, %v837_v53  ;;  %1172 = vrot.lane.b32.xlu1 %v837_v53, %s2521_s11 }
 0x254   : > { %1000 = vrot.lane.b32.xlu0 %v837_v53, %s2522_s29  ;;  %2059 = vmatprep.mubr.msk.f32.mxu1 %vm2519_vm0, %v2520_v1 }
 0x255   : > { %v833_v55 = vpop.f32.mrb[4].mxu1 }
 0x256   : > { %v2876_v56 = vadd.f32 %v1903_v54, %v833_v55  ;;  %v2051_v57 = vpop.f32.mrb[5].mxu1  ;;  %v1517_v55 = vld [vmem:[#allocation9 + $0x10] sm:$0xff] }
 0x257   : > { %1343 = vrot.lane.b32.xlu1 %v837_v53, %s2523_s16  ;;  %v1516_v53 = vld [vmem:[#allocation9 + $0x8] sm:$0xff] }
 0x258   : > { %1345 = vrot.lane.b32.xlu0 %v748_v48, %s2523_s16  ;;  %2058 = vmatpush3.msra.mxu1 %v2876_v56  ;;  %v2162_v54 = vpack.c.bf16 %v1516_v53, %v1515_v52 }
 0x259   : > { %2067 = vmatprep.subr.mxu1 %v2520_v1 }
 0x2c1   : > { %v1003_v58 = vpop.permute.xlu0 %1002  ;;  %v1175_v59 = vpop.permute.xlu1 %1174 }
 0x2c2   : > { %2063 = vmatpush3.xpose.msk.msra.mxu0 %vm838_vm2, %v1003_v58 }
 0x2c3   : > { %2072 = vmatprep.subr.mxu0 %v2520_v1 }
 0x2c5   : > { %v1173_v61 = vpop.permute.xlu1 %1172 }
 0x2c6   : > { %v1001_v60 = vpop.permute.xlu0 %1000 }
 0x2c7   : > { %2065 = vmatmul.mubr.msk.f32.vlgmr.msra.gmra.mrb[6].mxu0 %vm838_vm2, %v1001_v60 }
 0x2c8   : > { %2073 = vmatpush3.xpose.msk.msra.mxu0 %vm838_vm2, %v1175_v59  ;;  %2074 = vmatprep.mubr.msk.f32.mxu0 %vm2519_vm0, %v2520_v1 }
 0x2c9   : > { %2082 = vmatprep.subr.mxu0 %v2520_v1  ;;  %v1344_v63 = vpop.permute.xlu1 %1343 }
 0x2ca   : > { %v1346_v62 = vpop.permute.xlu0 %1345 }
 0x2cb   : > { %2075 = vmatmul.mubr.msk.f32.vlgmr.msra.gmra.mrb[8].mxu0 %vm838_vm2, %v1173_v61  ;;  %v1600_v61 = vld [vmem:[#allocation11] sm:$0xff] }
 0x2cc   : > { %2083 = vmatpush3.xpose.msk.msra.mxu0 %vm838_vm2, %v1346_v62  ;;  %2084 = vmatprep.mubr.msk.f32.mxu0 %vm2519_vm0, %v2520_v1  ;;  %v1601_v62 = vld [vmem:[#allocation11 + $0x8] sm:$0xff] }
 0x2cd   : > { %2161 = vmatprep.subr.bf16.mxu0 %v2518_v0 }
 0x2cf   : > { %2085 = vmatmul.mubr.msk.f32.vlgmr.msra.gmra.mrb[10].mxu0 %vm838_vm2, %v1344_v63 }
 0x2d0   : > { %2100 = vmatprep.mubr.msk.f32.mxu0 %vm2519_vm0, %v2520_v1  ;;  %2163 = vmatpush3.bf16.msra.mxu0 %v2162_v54 }
 0x2d1   : > { %2164 = vmatprep.subr.bf16.mxu0 %v2518_v0 }
 0x326   : > { %v911_v2 = vpop.f32.mrb[6].mxu1 }
 0x327   : > { %v2056_v3 = vpop.f32.mrb[7].mxu1  ;;  %v915_v4 = vsel %vm838_vm2, %v911_v2, -inf }
 0x328   : > { %916 = vmax.xlane.f32.xlu0 %v915_v4 }
 0x39a   : > { %v1074_v5 = vpop.f32.mrb[6].mxu0 }
 0x39b   : > { %v2066_v6 = vpop.f32.mrb[7].mxu0  ;;  %v1078_v7 = vsel %vm838_vm2, %v1074_v5, -inf }
 0x39c   : > { %1079 = vmax.xlane.f32.xlu1 %v1078_v7 }
 0x39e   : > { %v1246_v8 = vpop.f32.mrb[8].mxu0 }
 0x39f   : > { %v2076_v9 = vpop.f32.mrb[9].mxu0  ;;  %v1250_v10 = vsel %vm838_vm2, %v1246_v8, -inf }
 0x3a0   : > { %1251 = vmax.xlane.f32.xlu0 %v1250_v10  ;;  %v1602_v9 = vld [vmem:[#allocation11 + $0x10] sm:$0xff]  ;;  %v1603_v10 = vld [vmem:[#allocation11 + $0x18] sm:$0xff] }
 0x3a2   : > { %v1417_v11 = vpop.f32.mrb[10].mxu0 }
 0x3a3   : > { %v2086_v12 = vpop.f32.mrb[11].mxu0  ;;  %v1421_v13 = vsel %vm838_vm2, %v1417_v11, -inf }
 0x3a4   : > { %1422 = vmax.xlane.f32.xlu0 %v1421_v13  ;;  %v1678_v12 = vld [vmem:[#allocation11 + $0x20] sm:$0xff]  ;;  %v1679_v13 = vld [vmem:[#allocation11 + $0x28] sm:$0xff] }
 0x3ad   : > { %1090 = vrot.lane.b32.xlu1 %v2876_v56, %s2522_s29 }
 0x3b5   : > { %v917_v14 = vpop.xlane.xlu0 %916 }
 0x3b6   : > { %v918_v15 = vsub.f32 %v911_v2, %v917_v14  ;;  %v2168_v2 = vpack.c.bf16 %v1601_v62, %v1600_v61  ;;  %v1680_v14 = vld [vmem:[#allocation11 + $0x30] sm:$0xff] }
 0x3b8   : > { %v919_v16 = vmul.f32 1.442695, %v918_v15  ;;  %v2174_v15 = vpack.c.bf16 %v1679_v13, %v1678_v12 }
 0x3ba   : > { %2277 = vpow2.f32 %v919_v16  ;;  %v1681_v16 = vld [vmem:[#allocation11 + $0x38] sm:$0xff] }
 0x3c4   : > { %v2278_v17 = vpop.eup %2277 }
 0x3c5   : > { %v921_v19 = vsel %vm838_vm2, %v2278_v17, 0.0 }
 0x3d1   : > { %922 = vadd.xlane.f32.xlu1 %v921_v19 }
 0x429   : > { %v1080_v20 = vpop.xlane.xlu1 %1079 }
 0x42a   : > { %v1081_v21 = vsub.f32 %v1074_v5, %v1080_v20 }
 0x42c   : > { %v1082_v22 = vmul.f32 1.442695, %v1081_v21 }
 0x42d   : > { %v1252_v23 = vpop.xlane.xlu0 %1251  ;;  %v1091_v35 = vpop.permute.xlu1 %1090 }
 0x42e   : > { %2279 = vpow2.f32 %v1082_v22  ;;  %v1253_v24 = vsub.f32 %v1246_v8, %v1252_v23 }
 0x430   : > { %v1254_v25 = vmul.f32 1.442695, %v1253_v24 }
 0x431   : > { %v1423_v26 = vpop.xlane.xlu0 %1422 }
 0x432   : > { %2281 = vpow2.f32 %v1254_v25  ;;  %v1424_v27 = vsub.f32 %v1417_v11, %v1423_v26  ;;  %v2171_v11 = vpack.c.bf16 %v1603_v10, %v1602_v9 }
 0x434   : > { %v1425_v28 = vmul.f32 1.442695, %v1424_v27 }
 0x436   : > { %2283 = vpow2.f32 %v1425_v28 }
 0x438   : > { %v2280_v29 = vpop.eup %2279 }
 0x439   : > { %v1084_v30 = vsel %vm838_vm2, %v2280_v29, 0.0 }
 0x43a   : > { %1085 = vadd.xlane.f32.xlu0 %v1084_v30 }
 0x43c   : > { %v2282_v31 = vpop.eup %2281 }
 0x43d   : > { %v1256_v32 = vsel %vm838_vm2, %v2282_v31, 0.0 }
 0x43e   : > { %1257 = vadd.xlane.f32.xlu1 %v1256_v32 }
 0x440   : > { %v2284_v33 = vpop.eup %2283 }
 0x441   : > { %v1427_v34 = vsel %vm838_vm2, %v2284_v33, 0.0 }
 0x442   : > { %1428 = vadd.xlane.f32.xlu0 %v1427_v34 }
 0x44f   : > { %1432 = vrot.lane.b32.xlu1 %v2876_v56, %s2523_s16  ;;  %s1757_s16 = scalar_lea.sflag [#allocation5], %s2796_s22 }
 0x458   : > { %1261 = vrot.lane.b32.xlu0 %v2876_v56, %s2521_s11  ;;  %v1518_v56 = vld [vmem:[#allocation9 + $0x18] sm:$0xff]  ;;  %s1770_s11 = sshll.u32 %s351_s21, 4  ;;  %s2948_s11 = int_to_ptr.vmem [resolvable:$true] %s1770_s11 }
 0x459   : > { %v2165_v57 = vpack.c.bf16 %v1518_v56, %v1517_v55  ;;  %s2435_s30 = scalar_lea.vmem %s2948_s11, 128 }
 0x45a   : > { %p2436_p6 = scmp.ne.s32.totalorder %s2948_s11, %s2435_s30 }
 0x45b   : > { %2166 = vmatpush3.bf16.msra.mxu0 %v2165_v57 }
 0x45c   : > { %2173 = vmatprep.subr.bf16.mxu0 %v2518_v0  ;;  %p2437_p7 = pnand %p2436_p6, %p3016_p5 }
 0x45e   : > { %v923_v36 = vpop.xlane.xlu1 %922  ;;  %p2438_p9 = pneg %p2437_p7 }
 0x45f   : > { %2285 = vrcp.f32 %v923_v36 }
 0x469   : > { %v2286_v37 = vpop.eup %2285 }
 0x46a   : > { %v925_v38 = vmul.f32 %v2286_v37, %v2278_v17  ;;  %v2177_v17 = vpack.c.bf16 %v1681_v16, %v1680_v14 }
 0x46c   : > { %2060 = vmatmul.mubr.msk.f32.vlgmr.msra.gmra.mrb[8].mxu1 %vm838_vm2, %v925_v38 }
 0x46d   : > { %2068 = vmatpush3.msra.mxu1 %v1091_v35  ;;  %2069 = vmatprep.mubr.msk.f32.mxu1 %vm2519_vm0, %v2520_v1 }
 0x46e   : > { %2077 = vmatprep.subr.mxu1 %v2520_v1 }
 0x4c7   : > { %v1086_v39 = vpop.xlane.xlu0 %1085 }
 0x4c8   : > { %2287 = vrcp.f32 %v1086_v39 }
 0x4cb   : > { %v1258_v40 = vpop.xlane.xlu1 %1257 }
 0x4cc   : > { %2289 = vrcp.f32 %v1258_v40 }
 0x4cf   : > { %v1429_v41 = vpop.xlane.xlu0 %1428  ;;  %v1433_v47 = vpop.permute.xlu1 %1432 }
 0x4d0   : > { %2291 = vrcp.f32 %v1429_v41 }
 0x4d2   : > { %v2288_v42 = vpop.eup %2287 }
 0x4d3   : > { %v1088_v43 = vmul.f32 %v2288_v42, %v2280_v29  ;;  %v1262_v44 = vpop.permute.xlu0 %1261 }
 0x4d5   : > { %2070 = vmatmul.mubr.msk.f32.vlgmr.msra.gmra.mrb[10].mxu1 %vm838_vm2, %v1088_v43 }
 0x4d6   : > { %v2290_v45 = vpop.eup %2289  ;;  %2078 = vmatpush3.msra.mxu1 %v1262_v44  ;;  %2079 = vmatprep.mubr.msk.f32.mxu1 %vm2519_vm0, %v2520_v1 }
 0x4d7   : > { %v1260_v46 = vmul.f32 %v2290_v45, %v2282_v31  ;;  %2087 = vmatprep.subr.mxu1 %v2520_v1 }
 0x4d9   : > { %2080 = vmatmul.mubr.msk.f32.vlgmr.msra.gmra.mrb[12].mxu1 %vm838_vm2, %v1260_v46 }
 0x4da   : > { %v2292_v48 = vpop.eup %2291  ;;  %2088 = vmatpush3.msra.mxu1 %v1433_v47  ;;  %2089 = vmatprep.mubr.msk.f32.mxu1 %vm2519_vm0, %v2520_v1 }
 0x4db   : > { %v1431_v49 = vmul.f32 %v2292_v48, %v2284_v33  ;;  %2167 = vmatprep.subr.bf16.mxu1 %v2518_v0 }
 0x4dd   : > { %2090 = vmatmul.mubr.msk.f32.vlgmr.msra.gmra.mrb[14].mxu1 %vm838_vm2, %v1431_v49 }
 0x4de   : > { %2111 = vmatprep.mubr.msk.f32.mxu1 %vm2519_vm0, %v2520_v1  ;;  %2169 = vmatpush3.bf16.msra.mxu1 %v2168_v2 }
 0x4df   : > { %2170 = vmatprep.subr.bf16.mxu1 %v2518_v0 }
 0x4e2   : > { %2172 = vmatpush3.bf16.msra.mxu1 %v2171_v11 }
 0x53f   : > { %v995_v50 = vpop.f32.mrb[8].mxu1 }
 0x540   : > { %999 = vst.msk [vmem:[#allocation2] sm:$0xff] %vm838_vm2, %v995_v50  ;;  %v2061_v51 = vpop.f32.mrb[9].mxu1 }
 0x5a8   : > { %v1162_v58 = vpop.f32.mrb[10].mxu1 }
 0x5a9   : > { %1167 = vrot.lane.b32.xlu1 %v1162_v58, %s2524_s17  ;;  %v2071_v59 = vpop.f32.mrb[11].mxu1  ;;  %s2439_s17 = sshll.u32 %s2527_s18, 4  ;;  %s2440_s17 = int_to_ptr.vmem [resolvable:$false] %s2439_s17 }
 0x5aa   : > { %p2442_p12 = scmp.lt.s32.totalorder %s2948_s11, %s2440_s17 }
 0x5ac   : > { %v1333_v60 = vpop.f32.mrb[12].mxu1 }
 0x5ad   : > { %1338 = vrot.lane.b32.xlu0 %v1333_v60, %s2525_s14  ;;  %v2081_v63 = vpop.f32.mrb[13].mxu1  ;;  %s2441_s14 = scalar_lea.vmem %s2440_s17, 256 }
 0x5ae   : > { %p2443_p3 = scmp.lt.s32.totalorder %s2441_s14, %s2435_s30 }
 0x5b0   : > { %v1504_v3 = vpop.f32.mrb[14].mxu1  ;;  %p2444_p13 = por %p2443_p3, %p2442_p12 }
 0x5b1   : > { %1509 = vrot.lane.b32.xlu1 %v1504_v3, %s2526_s20  ;;  %v2091_v4 = vpop.f32.mrb[15].mxu1 }
 0x5b2   : > { %p2445_p0 = pnand %p2444_p13, %p2438_p9 }
 0x61b   : > { %v1168_v5 = vpop.permute.xlu1 %1167 }
 0x61c   : > { %1171 = vst.msk [vmem:[#allocation2] sm:$0xff] %vm1170_vm3, %v1168_v5 }
 0x61f   : > { %v1339_v6 = vpop.permute.xlu0 %1338 }
 0x620   : > { %1342 = vst.msk [vmem:[#allocation2] sm:$0xff] %vm1341_vm4, %v1339_v6 }
 0x623   : > { %v1510_v7 = vpop.permute.xlu1 %1509 }
 0x624   : > { %1513 = vst.msk [vmem:[#allocation2] sm:$0xff] %vm1512_vm5, %v1510_v7 }
 0x62b   : > { %v1514_v8 = vld [vmem:[#allocation2] sm:$0xff] }
 0x62c   : > { %2101 = vmatmul.mubr.msk.f32.vlgmr.msra.gmra.mrb[12].mxu0 %vm357_vm1, %v1514_v8 }
 0x62d   : > { %2122 = vmatprep.mubr.msk.f32.mxu0 %vm2519_vm0, %v2520_v1  ;;  %2175 = vmatpush3.bf16.msra.mxu0 %v2174_v15  ;;  %v1917_v1 = vld [vmem:[%s2996_s5] ss:$0 sm:$0xff] }
 0x62e   : > { %2176 = vmatprep.subr.bf16.mxu0 %v2518_v0 }
 0x631   : > { %2178 = vmatpush3.bf16.msra.mxu0 %v2177_v17 }
 0x6ff   : > { %v1595_v19 = vpop.f32.mrb[12].mxu0 }
 0x700   : > { %v1596_v20 = vadd.f32 %v1917_v1, %v1595_v19  ;;  %v2102_v21 = vpop.f32.mrb[13].mxu0 }
 0x702   : > { %v1599_v22 = vadd.f32 %v1596_v20, %v2825_v18 }
 0x704   : > { %2112 = vmatmul.mubr.msk.f32.vlgmr.msra.gmra.mrb[16].mxu1 %vm357_vm1, %v1599_v22 }
 0x7d7   : > { %v1673_v23 = vpop.f32.mrb[16].mxu1 }
 0x7d8   : > { %v2113_v24 = vpop.f32.mrb[17].mxu1  ;;  %2123 = vmatmul.mubr.msk.f32.vlgmr.msra.gmra.mrb[14].mxu0 %vm357_vm1, %v1673_v23 }
 0x8ab   : > { %v1751_v0 = vpop.f32.mrb[14].mxu0 }
 0x8ac   : > { %v1752_v25 = vadd.f32 %v1751_v0, %v1599_v22  ;;  %v2124_v26 = vpop.f32.mrb[15].mxu0 }
 0x8ae   : > { %1755 = vst.msk [vmem:[%s351_s21] sm:$0xff] %vm357_vm1, %v1752_v25 }
 0x8af   : > { %2448 = shalt.err (!%p2445_p0)
}
 0x8b0   : > { %s2449_s22 = scalar_lea.hbm %s2946_s10, 128  ;;  %s2453_s23 = scalar_lea.hbm %s2998_s7, 256 }
 0x8b1   : > { %p2450_p2 = scmp.ne.s32.totalorder %s2946_s10, %s2449_s22  ;;  %p2454_p10 = scmp.lt.u32.totalorder %s2946_s10, %s2998_s7 }
 0x8b2   : > { %p2455_p11 = scmp.lt.u32.totalorder %s2453_s23, %s2449_s22  ;;  %p2457_p6 = scmp.lt.u32.totalorder %s2449_s22, %s2946_s10 }
 0x8b3   : > { %p2451_p8 = pnand %p2450_p2, %p3016_p5 }
 0x8b4   : > { %p2456_p1 = por %p2455_p11, %p2454_p10 }
 0x8b5   : > { %p2452_p4 = pneg %p2451_p8 }
 0x8b6   : > { %p2458_p7 = por %p2457_p6, %p2456_p1 }
 0x8b8   : > { %p2459_p9 = pnand %p2458_p7, %p2452_p4 }
 0x8ba   : > { %2462 = shalt.err (!%p2459_p9)
}
 0x8bb   : > { %2197 = dma.vmem_to_hbm [thread:$0]  (%p3016_p5), %s2948_s11, 128, %s2946_s10, %s1757_s16  }
 0x8bc PF: > { %s1782_s29 = sand.u32 1, %s2497_s24   ;;  %p3017_p12 = scmp.ne.s32.totalorder %s3009_s15, 0 }
 0x8bd   : > { %p3018_p3 = scmp.ge.s32.totalorder %s2509_s27, 2  ;;  %s1783_s28 = scalar_lea.sflag [#allocation5], %s1782_s29 }
 0x8bf   : > { %p2217_p13 = pnand %p3018_p3, %p3017_p12 }
 0x8c1   : > { %2492 = dma.done.wait (!%p2217_p13), %s1783_s28, 128  }
 0x8c2   : > { %2494 = vsyncadd (!%p2217_p13), %s1783_s28, 4294967168  ;;  %p22_p0 = scmp.ge.s32.totalorder %s2720_s19, 4   ;;  %s3019_s24 = smov %s2501_s25 }
 0x8c3   : > { %s3020_s25 = smov %s2505_s26  ;;  %s3021_s26 = smov %s2731_s12 }
 0x8c4   : > { %s3022_s27 = smov %s2720_s19  ;;  %24 = sbr.rel (!%p22_p0) target bundleno = 7 (0x7), region = 116 }
 0x8cb   :  { %1788 = vsyncpa [#allocation4], 1 }
 0x8cc   :  { %1790 = vsyncpa [#allocation4 + $0x1], 1 }
 0x8cd   :  { %1791 = vsyncpa [#allocation7], 1 }
 0x8ce   :  { %1792 = vsyncpa [#allocation10], 1 }
 0x8cf   :  { %1793 = vsyncpa [#allocation5], 1 }
 0x8d0   :  { %1795 = vsyncpa [#allocation5 + $0x1], 1 }

</bundles_post_ra>
